<compile_context>
chip_gen: v5e
topology: v5e:2x2
jax: 0.10.0
libtpu: 0.0.40
codegen_flags: <defaults>
</compile_context>

<pallas_src>
import math

import jax
import jax.numpy as jnp
from jax.experimental import pallas as pl
from jax.experimental.pallas import tpu as pltpu

# ---------------------------------------------------------------- config ----
embedding_size = 2
n_hidden = 4
n_step = 2

sentences = ['I like toys', 'I love dad', 'I hate getting-hit', 'I believe mom']
# sorted() so the vocabulary order is deterministic across runs
word_list = sorted(set(' '.join(sentences).split()))
word2idx = {w: i for i, w in enumerate(word_list)}
voc_size = len(word_list)          # 9

LANE = 128                          # TPU lane width
TB = 256                            # batch tile: 256 = one MXU row pass (v6e/v7x)

F_IN = n_step * embedding_size                      # 4  (in-features, NOT padded)
H_PAD = 8                                           # hidden padded 4 -> 8 (sublane)
V_PAD = LANE * math.ceil(voc_size / LANE)           # 128 (lane-dense logits)

# vocab lane tile: bounded tiles once voc_size grows (v7x VMEM), 128-multiples
if V_PAD % 512 == 0:
    TV = 512
elif V_PAD % 256 == 0:
    TV = 256
else:
    TV = 128


def _pad2d(x, rows, cols):
    return jnp.pad(x, ((0, rows - x.shape[0]), (0, cols - x.shape[1])))


# ---------------------------------------------------------------- kernel ----
def nplm_kernel(x_ref, w1_ref, b1_ref, w2_ref, b2_ref, out_ref):
    # x: [TB, F_IN] bf16, w1: [F_IN, H_PAD] bf16, b1: [1, H_PAD] f32
    h = jnp.dot(x_ref[...], w1_ref[...], preferred_element_type=jnp.float32)
    h = jnp.maximum(h + b1_ref[...], 0.0)            # bias + relu in f32 (VPU)
    # logits tile: [TB, TV] f32 accumulation, bf16 MXU inputs (K = H_PAD = 8)
    out = jnp.dot(h.astype(w2_ref.dtype), w2_ref[...],
                  preferred_element_type=jnp.float32)
    out_ref[...] = out + b2_ref[...]                 # lane-dense f32 store


# --------------------------------------------------------------- wrapper ----
def prepare_params(C, W1, b1, W2, b2):
    """One-time parameter prep (hoisted out of the per-call path).

    PyTorch Linear stores W as [out, in]; the kernel consumes [in, out].
    Weights are cast to bf16; biases stay f32 and are padded.
    """
    return (
        C.astype(jnp.bfloat16),                                   # [V, E]
        _pad2d(W1.T, F_IN, H_PAD).astype(jnp.bfloat16),           # [F_IN, H_PAD]
        _pad2d(b1.reshape(1, -1), 1, H_PAD).astype(jnp.float32),  # [1, H_PAD]
        _pad2d(W2.T, H_PAD, V_PAD).astype(jnp.bfloat16),          # [H_PAD, V_PAD]
        _pad2d(b2.reshape(1, -1), 1, V_PAD).astype(jnp.float32),  # [1, V_PAD]
    )


@jax.jit
def nplm_forward(X_idx, C_bf, W1_p, b1_p, W2_p, b2_p):
    """X_idx: int32 [B, n_step]. Returns logits [B, voc_size] (float32)."""
    B = X_idx.shape[0]
    B_pad = TB * pl.cdiv(B, TB)

    # Embedding lookup = gather in the wrapper (replaces any one-hot matmul).
    x = C_bf[X_idx].reshape(B, F_IN)                 # [B, n_step*E] bf16
    x = _pad2d(x, B_pad, F_IN)                       # zero-pad batch rows only

    grid = (B_pad // TB, V_PAD // TV)

    out = pl.pallas_call(
        nplm_kernel,
        out_shape=jax.ShapeDtypeStruct((B_pad, V_PAD), jnp.float32),
        grid=grid,
        in_specs=[
            # activations: tiled over batch rows, narrow K (= full last dim 4)
            pl.BlockSpec((TB, F_IN), lambda i, j: (i, 0)),
            # layer-1 weights/bias: constant index_map -> VMEM-resident
            pl.BlockSpec((F_IN, H_PAD), lambda i, j: (0, 0)),
            pl.BlockSpec((1, H_PAD), lambda i, j: (0, 0)),
            # layer-2 weights/bias: tiled over vocab lanes
            pl.BlockSpec((H_PAD, TV), lambda i, j: (0, j)),
            pl.BlockSpec((1, TV), lambda i, j: (0, j)),
        ],
        out_specs=pl.BlockSpec((TB, TV), lambda i, j: (i, j)),
        compiler_params=pltpu.CompilerParams(
            # both axes independent: batch shards across v7x's 2 TCs
            dimension_semantics=("parallel", "parallel")),
    )(x, W1_p, b1_p, W2_p, b2_p)

    return out[:B, :voc_size]                        # strip row / lane padding


# ------------------------------------------------------------- reference ----
def nplm_reference(X_idx, C, W1, b1, W2, b2):
    emb = C[X_idx]                                  # [B, n_step, E]
    x = emb.reshape(X_idx.shape[0], -1)             # [B, n_step*E]
    h = jnp.maximum(x @ W1.T + b1, 0.0)             # [B, n_hidden]
    return h @ W2.T + b2                            # [B, voc_size]


# ------------------------------------------------------------------ main ----
if __name__ == "__main__":
    key = jax.random.PRNGKey(0)
    k_c, k_w1, k_b1, k_w2, k_b2 = jax.random.split(key, 5)

    # deterministic synthetic parameters (shapes from NPLM.__init__)
    C = jax.random.normal(k_c, (voc_size, embedding_size), jnp.float32)
    W1 = jax.random.normal(k_w1, (n_hidden, n_step * embedding_size), jnp.float32) * 0.5
    b1 = jax.random.normal(k_b1, (n_hidden,), jnp.float32) * 0.1
    W2 = jax.random.normal(k_w2, (voc_size, n_hidden), jnp.float32) * 0.5
    b2 = jax.random.normal(k_b2, (voc_size,), jnp.float32) * 0.1

    # input batch: first n_step words of each sentence (as in NPLM training)
    X_idx = jnp.array(
        [[word2idx[w] for w in s.split()[:n_step]] for s in sentences],
        dtype=jnp.int32)                            # [4, 2]

    params = prepare_params(C, W1, b1, W2, b2)      # hoisted, one-time prep
    out = jax.block_until_ready(nplm_forward(X_idx, *params))

    ref = nplm_reference(X_idx, C, W1, b1, W2, b2)
    assert out.shape == (len(sentences), voc_size)
    # bf16 weights/activations (f32 accumulation) -> relaxed tolerance vs f32 ref
    assert jnp.allclose(out, ref, atol=5e-2, rtol=5e-2), "mismatch vs reference"

    print("KERNEL_OK")
</pallas_src>

<mosaic_0001>
module attributes {stable_mosaic.version = 11 : i64} {
  func.func @nplm_kernel(%arg0: i32, %arg1: i32, %arg2: memref<256x4xbf16, #tpu.memory_space<vmem>>, %arg3: memref<4x8xbf16, #tpu.memory_space<vmem>>, %arg4: memref<1x8xf32, #tpu.memory_space<vmem>>, %arg5: memref<8x128xbf16, #tpu.memory_space<vmem>>, %arg6: memref<1x128xf32, #tpu.memory_space<vmem>>, %arg7: memref<256x128xf32, #tpu.memory_space<vmem>>) attributes {dimension_semantics = [#tpu.dimension_semantics<parallel>, #tpu.dimension_semantics<parallel>], iteration_bounds = array<i64: 1, 1>, scalar_prefetch = 0 : i64, scratch_operands = 0 : i64, tpu.core_type = #tpu.core_type<tc>, window_params = [{transform_indices = @transform_0, window_bounds = array<i64: 256, 4>}, {pipeline_mode = #tpu.pipeline_mode<synchronous>, transform_indices = @transform_1, window_bounds = array<i64: 4, 8>}, {pipeline_mode = #tpu.pipeline_mode<synchronous>, transform_indices = @transform_2, window_bounds = array<i64: 1, 8>}, {transform_indices = @transform_3, window_bounds = array<i64: 8, 128>}, {transform_indices = @transform_4, window_bounds = array<i64: 1, 128>}, {transform_indices = @transform_5, window_bounds = array<i64: 256, 128>}]} {
    %c0 = arith.constant 0 : index
    %c0_0 = arith.constant 0 : index
    %0 = vector.load %arg2[%c0, %c0_0] : memref<256x4xbf16, #tpu.memory_space<vmem>>, vector<256x4xbf16>
    %c0_1 = arith.constant 0 : index
    %c0_2 = arith.constant 0 : index
    %1 = vector.load %arg3[%c0_1, %c0_2] : memref<4x8xbf16, #tpu.memory_space<vmem>>, vector<4x8xbf16>
    %cst = arith.constant dense<0.000000e+00> : vector<256x8xf32>
    %2 = tpu.matmul %0, %1, %cst {dimension_numbers = #tpu.dot_dimension_numbers<[1], [0], [0], [1], [0, 0, 1, 1], [], []>} : vector<256x4xbf16>, vector<4x8xbf16>, vector<256x8xf32> -> vector<256x8xf32>
    %c0_3 = arith.constant 0 : index
    %c0_4 = arith.constant 0 : index
    %3 = vector.load %arg4[%c0_3, %c0_4] : memref<1x8xf32, #tpu.memory_space<vmem>>, vector<1x8xf32>
    %4 = vector.broadcast %3 : vector<1x8xf32> to vector<256x8xf32>
    %5 = arith.addf %2, %4 : vector<256x8xf32>
    %cst_5 = arith.constant 0.000000e+00 : f32
    %6 = vector.broadcast %cst_5 : f32 to vector<256x8xf32>
    %7 = arith.maximumf %5, %6 : vector<256x8xf32>
    %8 = arith.truncf %7 : vector<256x8xf32> to vector<256x8xbf16>
    %c0_6 = arith.constant 0 : index
    %c0_7 = arith.constant 0 : index
    %9 = vector.load %arg5[%c0_6, %c0_7] : memref<8x128xbf16, #tpu.memory_space<vmem>>, vector<8x128xbf16>
    %cst_8 = arith.constant dense<0.000000e+00> : vector<256x128xf32>
    %10 = tpu.matmul %8, %9, %cst_8 {dimension_numbers = #tpu.dot_dimension_numbers<[1], [0], [0], [1], [0, 0, 1, 1], [], []>} : vector<256x8xbf16>, vector<8x128xbf16>, vector<256x128xf32> -> vector<256x128xf32>
    %c0_9 = arith.constant 0 : index
    %c0_10 = arith.constant 0 : index
    %11 = vector.load %arg6[%c0_9, %c0_10] : memref<1x128xf32, #tpu.memory_space<vmem>>, vector<1x128xf32>
    %12 = vector.broadcast %11 : vector<1x128xf32> to vector<256x128xf32>
    %13 = arith.addf %10, %12 : vector<256x128xf32>
    %c0_11 = arith.constant 0 : index
    %c0_12 = arith.constant 0 : index
    %14 = vector.load %arg7[%c0_11, %c0_12] : memref<256x128xf32, #tpu.memory_space<vmem>>, vector<256x128xf32>
    tpu.vector_store %arg7[%c0_11, %c0_12], %13 {strides = array<i32>} : memref<256x128xf32, #tpu.memory_space<vmem>>, vector<256x128xf32>,
    return
  }
  func.func @transform_0(%arg0: i32, %arg1: i32) -> (i32, i32) {
    %c0_i32 = arith.constant 0 : i32
    %c0_i32_0 = arith.constant 0 : i32
    return %arg0, %c0_i32 : i32, i32
  }
  func.func @transform_1(%arg0: i32, %arg1: i32) -> (i32, i32) {
    %c0_i32 = arith.constant 0 : i32
    %c0_i32_0 = arith.constant 0 : i32
    %c0_i32_1 = arith.constant 0 : i32
    return %c0_i32, %c0_i32_0 : i32, i32
  }
  func.func @transform_2(%arg0: i32, %arg1: i32) -> (i32, i32) {
    %c0_i32 = arith.constant 0 : i32
    %c0_i32_0 = arith.constant 0 : i32
    %c0_i32_1 = arith.constant 0 : i32
    return %c0_i32, %c0_i32_0 : i32, i32
  }
  func.func @transform_3(%arg0: i32, %arg1: i32) -> (i32, i32) {
    %c0_i32 = arith.constant 0 : i32
    %c0_i32_0 = arith.constant 0 : i32
    return %c0_i32, %arg1 : i32, i32
  }
  func.func @transform_4(%arg0: i32, %arg1: i32) -> (i32, i32) {
    %c0_i32 = arith.constant 0 : i32
    %c0_i32_0 = arith.constant 0 : i32
    return %c0_i32, %arg1 : i32, i32
  }
  func.func @transform_5(%arg0: i32, %arg1: i32) -> (i32, i32) {
    %c0_i32 = arith.constant 0 : i32
    return %arg0, %arg1 : i32, i32
  }
}

</mosaic_0001>

<bundles_post_ra>
// kernel: nplm_forward.1
= control target key start
LH: loop header
LB: loop body
LE: loop exit
PB: predicated region body
PF: predicated region fallthrough
CT: control target
= control target key end

     0   :  { %vm187_vm0 = vcmask 1041408   ;;  %vm138_vm1 = vcmask 31744   ;;  %vm382_vm2 = vcmask 1043456   ;;  %vm333_vm3 = vcmask 64512   ;;  %s913_s1 = inlined_call_operand.vmem [shape: bf16[4,8], index: 1, kind: input, shape index: {}]   ;;  %s914_s0 = inlined_call_operand.vmem [shape: bf16[256,4], index: 0, kind: input, shape index: {}]   ;;  %s915_s2 = inlined_call_operand.vmem [shape: f32[1,8], index: 2, kind: input, shape index: {}]   ;;  %s916_s3 = inlined_call_operand.vmem [shape: bf16[8,128], index: 3, kind: input, shape index: {}]   ;;  %s917_s4 = inlined_call_operand.vmem [shape: f32[1,128], index: 4, kind: input, shape index: {}]   ;;  %s918_s5 = inlined_call_operand.vmem [shape: f32[256,128], index: 5, kind: output, shape index: {}]  }
   0x1   :  { %v53_v0 = vld [vmem:[%s913_s1] sm:$0x3]  ;;  %v608_v4 = vld [vmem:[%s914_s0 + $0x8] sm:$0xff]  ;;  %v609_v6 = vld [vmem:[%s914_s0 + $0x10] sm:$0xff] }
   0x2   :  { %v189_v1 = vsel %vm187_vm0, %v53_v0, 0  ;;  %v607_v2 = vld [vmem:[%s914_s0] sm:$0xff]  ;;  %v616_v5 = vld [vmem:[%s914_s0 + $0x48] sm:$0xff]  ;;  %v617_v7 = vld [vmem:[%s914_s0 + $0x50] sm:$0xff] }
   0x3   :  { %v615_v3 = vld [vmem:[%s914_s0 + $0x40] sm:$0xff]  ;;  %198 = vmatpush.bf16.msra.mxu0 %v189_v1  ;;  %623 = vmatpush.bf16.msra.mxu2 %v189_v1  ;;  %v610_v8 = vld [vmem:[%s914_s0 + $0x18] sm:$0xff]  ;;  %v612_v12 = vld [vmem:[%s914_s0 + $0x28] sm:$0xff] }
   0x4   :  { %v618_v9 = vld [vmem:[%s914_s0 + $0x58] sm:$0xff]  ;;  %v611_v10 = vld [vmem:[%s914_s0 + $0x20] sm:$0xff]  ;;  %v620_v13 = vld [vmem:[%s914_s0 + $0x68] sm:$0xff] }
   0x5   :  { %v619_v11 = vld [vmem:[%s914_s0 + $0x60] sm:$0xff]  ;;  %v613_v14 = vld [vmem:[%s914_s0 + $0x30] sm:$0xff]  ;;  %v614_v18 = vld [vmem:[%s914_s0 + $0x38] sm:$0xff] }
   0x6   :  { %575 = vmatmul.msk.bf16.vlgmr.msra.gmra.mxu0 %vm138_vm1, %v607_v2  ;;  %583 = vmatmul.msk.bf16.vlgmr.msra.gmra.mxu2 %vm138_vm1, %v615_v3  ;;  %v621_v15 = vld [vmem:[%s914_s0 + $0x70] sm:$0xff]  ;;  %v328_v16 = vld [vmem:[%s916_s3] sm:$0xf]  ;;  %v622_v19 = vld [vmem:[%s914_s0 + $0x78] sm:$0xff] }
   0x7   :  { %v384_v17 = vsel %vm382_vm2, %v328_v16, 0  ;;  %v730_v21 = vld [vmem:[%s915_s2] ss:$0 sm:$0xff] }
   0x8   :  { %393 = vmatpush.bf16.msra.mxu1 %v384_v17  ;;  %624 = vmatpush.bf16.msra.mxu3 %v384_v17 }
  0x16   :  { %576 = vmatmul.msk.bf16.gmra.mxu0 %vm138_vm1, %v608_v4  ;;  %584 = vmatmul.msk.bf16.gmra.mxu2 %vm138_vm1, %v616_v5 }
  0x26   :  { %577 = vmatmul.msk.bf16.gmra.mxu0 %vm138_vm1, %v609_v6  ;;  %585 = vmatmul.msk.bf16.gmra.mxu2 %vm138_vm1, %v617_v7 }
  0x36   :  { %578 = vmatmul.msk.bf16.gmra.mxu0 %vm138_vm1, %v610_v8  ;;  %586 = vmatmul.msk.bf16.gmra.mxu2 %vm138_vm1, %v618_v9 }
  0x46   :  { %579 = vmatmul.msk.bf16.gmra.mxu0 %vm138_vm1, %v611_v10  ;;  %587 = vmatmul.msk.bf16.gmra.mxu2 %vm138_vm1, %v619_v11 }
  0x56   :  { %580 = vmatmul.msk.bf16.gmra.mxu0 %vm138_vm1, %v612_v12  ;;  %588 = vmatmul.msk.bf16.gmra.mxu2 %vm138_vm1, %v620_v13 }
  0x66   :  { %581 = vmatmul.msk.bf16.gmra.mxu0 %vm138_vm1, %v613_v14  ;;  %589 = vmatmul.msk.bf16.gmra.mxu2 %vm138_vm1, %v621_v15 }
  0x76   :  { %582 = vmatmul.msk.bf16.gmra.mxu0 %vm138_vm1, %v614_v18  ;;  %590 = vmatmul.msk.bf16.gmra.mxu2 %vm138_vm1, %v622_v19 }
  0x83   :  { %v200_v20 = vpop.f32.mrf.mxu0 }
  0x84   :  { %v201_v22 = vadd.f32 %v730_v21, %v200_v20 }
  0x86   :  { %v280_v25 = vmax.f32 %v201_v22, 0.0 }
  0x89   :  { %v240_v23 = vpop.f32.mrf.mxu2 }
  0x8a   :  { %v241_v28 = vadd.f32 %v730_v21, %v240_v23 }
  0x8b   :  { %v202_v24 = vpop.f32.mrf.mxu0 }
  0x8c   :  { %v203_v26 = vadd.f32 %v730_v21, %v202_v24  ;;  %v296_v33 = vmax.f32 %v241_v28, 0.0 }
  0x8e   :  { %v281_v27 = vmax.f32 %v203_v26, 0.0 }
  0x90   :  { %v312_v29 = vpack.c.bf16 %v281_v27, %v280_v25 }
  0x91   :  { %v242_v30 = vpop.f32.mrf.mxu2 }
  0x92   :  { %v243_v31 = vadd.f32 %v730_v21, %v242_v30  ;;  %591 = vmatmul.msk.bf16.vlgmr.msra.gmra.mxu1 %vm333_vm3, %v312_v29 }
  0x93   :  { %v205_v32 = vpop.f32.mrf.mxu0 }
  0x94   :  { %v297_v34 = vmax.f32 %v243_v31, 0.0  ;;  %v206_v36 = vadd.f32 %v730_v21, %v205_v32 }
  0x96   :  { %v320_v35 = vpack.c.bf16 %v297_v34, %v296_v33  ;;  %v282_v39 = vmax.f32 %v206_v36, 0.0 }
  0x98   :  { %599 = vmatmul.msk.bf16.vlgmr.msra.gmra.mxu3 %vm333_vm3, %v320_v35 }
  0x99   :  { %v245_v37 = vpop.f32.mrf.mxu2 }
  0x9a   :  { %v246_v42 = vadd.f32 %v730_v21, %v245_v37 }
  0x9b   :  { %v207_v38 = vpop.f32.mrf.mxu0 }
  0x9c   :  { %v208_v40 = vadd.f32 %v730_v21, %v207_v38  ;;  %v298_v47 = vmax.f32 %v246_v42, 0.0 }
  0x9e   :  { %v283_v41 = vmax.f32 %v208_v40, 0.0 }
  0xa0   :  { %v313_v43 = vpack.c.bf16 %v283_v41, %v282_v39 }
  0xa1   :  { %v247_v44 = vpop.f32.mrf.mxu2 }
  0xa2   :  { %v248_v45 = vadd.f32 %v730_v21, %v247_v44  ;;  %592 = vmatmul.msk.bf16.gmra.mxu1 %vm333_vm3, %v313_v43 }
  0xa3   :  { %v210_v46 = vpop.f32.mrf.mxu0 }
  0xa4   :  { %v299_v48 = vmax.f32 %v248_v45, 0.0  ;;  %v211_v50 = vadd.f32 %v730_v21, %v210_v46 }
  0xa6   :  { %v321_v49 = vpack.c.bf16 %v299_v48, %v298_v47  ;;  %v284_v53 = vmax.f32 %v211_v50, 0.0 }
  0xa8   :  { %600 = vmatmul.msk.bf16.gmra.mxu3 %vm333_vm3, %v321_v49 }
  0xa9   :  { %v250_v51 = vpop.f32.mrf.mxu2 }
  0xaa   :  { %v251_v56 = vadd.f32 %v730_v21, %v250_v51 }
  0xab   :  { %v212_v52 = vpop.f32.mrf.mxu0 }
  0xac   :  { %v213_v54 = vadd.f32 %v730_v21, %v212_v52  ;;  %v300_v61 = vmax.f32 %v251_v56, 0.0 }
  0xae   :  { %v285_v55 = vmax.f32 %v213_v54, 0.0 }
  0xb0   :  { %v314_v57 = vpack.c.bf16 %v285_v55, %v284_v53 }
  0xb1   :  { %v252_v58 = vpop.f32.mrf.mxu2 }
  0xb2   :  { %v253_v59 = vadd.f32 %v730_v21, %v252_v58  ;;  %593 = vmatmul.msk.bf16.gmra.mxu1 %vm333_vm3, %v314_v57 }
  0xb3   :  { %v215_v60 = vpop.f32.mrf.mxu0 }
  0xb4   :  { %v301_v62 = vmax.f32 %v253_v59, 0.0  ;;  %v216_v0 = vadd.f32 %v730_v21, %v215_v60 }
  0xb6   :  { %v322_v63 = vpack.c.bf16 %v301_v62, %v300_v61  ;;  %v286_v3 = vmax.f32 %v216_v0, 0.0 }
  0xb8   :  { %601 = vmatmul.msk.bf16.gmra.mxu3 %vm333_vm3, %v322_v63 }
  0xb9   :  { %v255_v1 = vpop.f32.mrf.mxu2 }
  0xba   :  { %v256_v6 = vadd.f32 %v730_v21, %v255_v1 }
  0xbb   :  { %v217_v2 = vpop.f32.mrf.mxu0 }
  0xbc   :  { %v218_v4 = vadd.f32 %v730_v21, %v217_v2  ;;  %v302_v11 = vmax.f32 %v256_v6, 0.0  ;;  %v783_v6 = vld [vmem:[%s917_s4] ss:$0 sm:$0xff] }
  0xbe   :  { %v287_v5 = vmax.f32 %v218_v4, 0.0 }
  0xc0   :  { %v315_v7 = vpack.c.bf16 %v287_v5, %v286_v3 }
  0xc1   :  { %v257_v8 = vpop.f32.mrf.mxu2 }
  0xc2   :  { %v258_v9 = vadd.f32 %v730_v21, %v257_v8  ;;  %594 = vmatmul.msk.bf16.gmra.mxu1 %vm333_vm3, %v315_v7 }
  0xc3   :  { %v220_v10 = vpop.f32.mrf.mxu0 }
  0xc4   :  { %v303_v12 = vmax.f32 %v258_v9, 0.0  ;;  %v221_v14 = vadd.f32 %v730_v21, %v220_v10 }
  0xc6   :  { %v323_v13 = vpack.c.bf16 %v303_v12, %v302_v11  ;;  %v288_v17 = vmax.f32 %v221_v14, 0.0 }
  0xc8   :  { %602 = vmatmul.msk.bf16.gmra.mxu3 %vm333_vm3, %v323_v13 }
  0xc9   :  { %v260_v15 = vpop.f32.mrf.mxu2 }
  0xca   :  { %v261_v20 = vadd.f32 %v730_v21, %v260_v15 }
  0xcb   :  { %v222_v16 = vpop.f32.mrf.mxu0 }
  0xcc   :  { %v223_v18 = vadd.f32 %v730_v21, %v222_v16  ;;  %v304_v26 = vmax.f32 %v261_v20, 0.0 }
  0xce   :  { %v289_v19 = vmax.f32 %v223_v18, 0.0 }
  0xd0   :  { %v316_v22 = vpack.c.bf16 %v289_v19, %v288_v17 }
  0xd1   :  { %v262_v23 = vpop.f32.mrf.mxu2 }
  0xd2   :  { %v263_v24 = vadd.f32 %v730_v21, %v262_v23  ;;  %595 = vmatmul.msk.bf16.gmra.mxu1 %vm333_vm3, %v316_v22 }
  0xd3   :  { %v225_v25 = vpop.f32.mrf.mxu0 }
  0xd4   :  { %v305_v27 = vmax.f32 %v263_v24, 0.0  ;;  %v226_v29 = vadd.f32 %v730_v21, %v225_v25 }
  0xd6   :  { %v324_v28 = vpack.c.bf16 %v305_v27, %v304_v26  ;;  %v290_v32 = vmax.f32 %v226_v29, 0.0 }
  0xd8   :  { %603 = vmatmul.msk.bf16.gmra.mxu3 %vm333_vm3, %v324_v28 }
  0xd9   :  { %v265_v30 = vpop.f32.mrf.mxu2 }
  0xda   :  { %v266_v35 = vadd.f32 %v730_v21, %v265_v30 }
  0xdb   :  { %v227_v31 = vpop.f32.mrf.mxu0 }
  0xdc   :  { %v228_v33 = vadd.f32 %v730_v21, %v227_v31  ;;  %v306_v40 = vmax.f32 %v266_v35, 0.0 }
  0xde   :  { %v291_v34 = vmax.f32 %v228_v33, 0.0 }
  0xe0   :  { %v317_v36 = vpack.c.bf16 %v291_v34, %v290_v32 }
  0xe1   :  { %v267_v37 = vpop.f32.mrf.mxu2 }
  0xe2   :  { %v268_v38 = vadd.f32 %v730_v21, %v267_v37  ;;  %596 = vmatmul.msk.bf16.gmra.mxu1 %vm333_vm3, %v317_v36 }
  0xe3   :  { %v230_v39 = vpop.f32.mrf.mxu0 }
  0xe4   :  { %v307_v41 = vmax.f32 %v268_v38, 0.0  ;;  %v231_v43 = vadd.f32 %v730_v21, %v230_v39 }
  0xe6   :  { %v325_v42 = vpack.c.bf16 %v307_v41, %v306_v40  ;;  %v292_v46 = vmax.f32 %v231_v43, 0.0 }
  0xe8   :  { %604 = vmatmul.msk.bf16.gmra.mxu3 %vm333_vm3, %v325_v42 }
  0xe9   :  { %v270_v44 = vpop.f32.mrf.mxu2 }
  0xea   :  { %v271_v49 = vadd.f32 %v730_v21, %v270_v44 }
  0xeb   :  { %v232_v45 = vpop.f32.mrf.mxu0 }
  0xec   :  { %v233_v47 = vadd.f32 %v730_v21, %v232_v45  ;;  %v308_v54 = vmax.f32 %v271_v49, 0.0 }
  0xee   :  { %v293_v48 = vmax.f32 %v233_v47, 0.0 }
  0xf0   :  { %v318_v50 = vpack.c.bf16 %v293_v48, %v292_v46 }
  0xf1   :  { %v272_v51 = vpop.f32.mrf.mxu2 }
  0xf2   :  { %v273_v52 = vadd.f32 %v730_v21, %v272_v51  ;;  %597 = vmatmul.msk.bf16.gmra.mxu1 %vm333_vm3, %v318_v50 }
  0xf3   :  { %v235_v53 = vpop.f32.mrf.mxu0 }
  0xf4   :  { %v309_v55 = vmax.f32 %v273_v52, 0.0  ;;  %v236_v57 = vadd.f32 %v730_v21, %v235_v53 }
  0xf6   :  { %v326_v56 = vpack.c.bf16 %v309_v55, %v308_v54  ;;  %v294_v60 = vmax.f32 %v236_v57, 0.0 }
  0xf8   :  { %605 = vmatmul.msk.bf16.gmra.mxu3 %vm333_vm3, %v326_v56 }
  0xf9   :  { %v275_v58 = vpop.f32.mrf.mxu2 }
  0xfa   :  { %v276_v63 = vadd.f32 %v730_v21, %v275_v58 }
  0xfb   :  { %v237_v59 = vpop.f32.mrf.mxu0 }
  0xfc   :  { %v238_v61 = vadd.f32 %v730_v21, %v237_v59  ;;  %v310_v3 = vmax.f32 %v276_v63, 0.0 }
  0xfe   :  { %v295_v62 = vmax.f32 %v238_v61, 0.0 }
 0x100   :  { %v319_v0 = vpack.c.bf16 %v295_v62, %v294_v60 }
 0x101   :  { %v277_v1 = vpop.f32.mrf.mxu2 }
 0x102   :  { %v278_v2 = vadd.f32 %v730_v21, %v277_v1  ;;  %598 = vmatmul.msk.bf16.gmra.mxu1 %vm333_vm3, %v319_v0 }
 0x104   :  { %v311_v4 = vmax.f32 %v278_v2, 0.0 }
 0x106   :  { %v327_v5 = vpack.c.bf16 %v311_v4, %v310_v3 }
 0x108   :  { %606 = vmatmul.msk.bf16.gmra.mxu3 %vm333_vm3, %v327_v5 }
 0x10f   :  { %v395_v7 = vpop.f32.mrf.mxu1 }
 0x110   :  { %v396_v8 = vadd.f32 %v783_v6, %v395_v7 }
 0x112   :  { %475 = vst [vmem:[%s918_s5] sm:$0xff] %v396_v8 }
 0x117   :  { %v397_v21 = vpop.f32.mrf.mxu1 }
 0x118   :  { %v398_v9 = vadd.f32 %v783_v6, %v397_v21 }
 0x11a   :  { %476 = vst [vmem:[%s918_s5 + $0x8] sm:$0xff] %v398_v9 }
 0x11b   :  { %v435_v10 = vpop.f32.mrf.mxu3 }
 0x11c   :  { %v436_v11 = vadd.f32 %v783_v6, %v435_v10 }
 0x11e   :  { %491 = vst [vmem:[%s918_s5 + $0x80] sm:$0xff] %v436_v11 }
 0x11f   :  { %v400_v12 = vpop.f32.mrf.mxu1 }
 0x120   :  { %v401_v13 = vadd.f32 %v783_v6, %v400_v12 }
 0x122   :  { %477 = vst [vmem:[%s918_s5 + $0x10] sm:$0xff] %v401_v13 }
 0x123   :  { %v437_v14 = vpop.f32.mrf.mxu3 }
 0x124   :  { %v438_v15 = vadd.f32 %v783_v6, %v437_v14 }
 0x126   :  { %492 = vst [vmem:[%s918_s5 + $0x88] sm:$0xff] %v438_v15 }
 0x127   :  { %v402_v16 = vpop.f32.mrf.mxu1 }
 0x128   :  { %v403_v17 = vadd.f32 %v783_v6, %v402_v16 }
 0x12a   :  { %478 = vst [vmem:[%s918_s5 + $0x18] sm:$0xff] %v403_v17 }
 0x12b   :  { %v440_v18 = vpop.f32.mrf.mxu3 }
 0x12c   :  { %v441_v19 = vadd.f32 %v783_v6, %v440_v18 }
 0x12e   :  { %493 = vst [vmem:[%s918_s5 + $0x90] sm:$0xff] %v441_v19 }
 0x12f   :  { %v405_v20 = vpop.f32.mrf.mxu1 }
 0x130   :  { %v406_v22 = vadd.f32 %v783_v6, %v405_v20 }
 0x132   :  { %479 = vst [vmem:[%s918_s5 + $0x20] sm:$0xff] %v406_v22 }
 0x133   :  { %v442_v23 = vpop.f32.mrf.mxu3 }
 0x134   :  { %v443_v24 = vadd.f32 %v783_v6, %v442_v23 }
 0x136   :  { %494 = vst [vmem:[%s918_s5 + $0x98] sm:$0xff] %v443_v24 }
 0x137   :  { %v407_v25 = vpop.f32.mrf.mxu1 }
 0x138   :  { %v408_v26 = vadd.f32 %v783_v6, %v407_v25 }
 0x13a   :  { %480 = vst [vmem:[%s918_s5 + $0x28] sm:$0xff] %v408_v26 }
 0x13b   :  { %v445_v27 = vpop.f32.mrf.mxu3 }
 0x13c   :  { %v446_v28 = vadd.f32 %v783_v6, %v445_v27 }
 0x13e   :  { %495 = vst [vmem:[%s918_s5 + $0xa0] sm:$0xff] %v446_v28 }
 0x13f   :  { %v410_v29 = vpop.f32.mrf.mxu1 }
 0x140   :  { %v411_v30 = vadd.f32 %v783_v6, %v410_v29 }
 0x142   :  { %481 = vst [vmem:[%s918_s5 + $0x30] sm:$0xff] %v411_v30 }
 0x143   :  { %v447_v31 = vpop.f32.mrf.mxu3 }
 0x144   :  { %v448_v32 = vadd.f32 %v783_v6, %v447_v31 }
 0x146   :  { %496 = vst [vmem:[%s918_s5 + $0xa8] sm:$0xff] %v448_v32 }
 0x147   :  { %v412_v33 = vpop.f32.mrf.mxu1 }
 0x148   :  { %v413_v34 = vadd.f32 %v783_v6, %v412_v33 }
 0x14a   :  { %482 = vst [vmem:[%s918_s5 + $0x38] sm:$0xff] %v413_v34 }
 0x14b   :  { %v450_v35 = vpop.f32.mrf.mxu3 }
 0x14c   :  { %v451_v36 = vadd.f32 %v783_v6, %v450_v35 }
 0x14e   :  { %497 = vst [vmem:[%s918_s5 + $0xb0] sm:$0xff] %v451_v36 }
 0x14f   :  { %v415_v37 = vpop.f32.mrf.mxu1 }
 0x150   :  { %v416_v38 = vadd.f32 %v783_v6, %v415_v37 }
 0x152   :  { %483 = vst [vmem:[%s918_s5 + $0x40] sm:$0xff] %v416_v38 }
 0x153   :  { %v452_v39 = vpop.f32.mrf.mxu3 }
 0x154   :  { %v453_v40 = vadd.f32 %v783_v6, %v452_v39 }
 0x156   :  { %498 = vst [vmem:[%s918_s5 + $0xb8] sm:$0xff] %v453_v40 }
 0x157   :  { %v417_v41 = vpop.f32.mrf.mxu1 }
 0x158   :  { %v418_v42 = vadd.f32 %v783_v6, %v417_v41 }
 0x15a   :  { %484 = vst [vmem:[%s918_s5 + $0x48] sm:$0xff] %v418_v42 }
 0x15b   :  { %v455_v43 = vpop.f32.mrf.mxu3 }
 0x15c   :  { %v456_v44 = vadd.f32 %v783_v6, %v455_v43 }
 0x15e   :  { %499 = vst [vmem:[%s918_s5 + $0xc0] sm:$0xff] %v456_v44 }
 0x15f   :  { %v420_v45 = vpop.f32.mrf.mxu1 }
 0x160   :  { %v421_v46 = vadd.f32 %v783_v6, %v420_v45 }
 0x162   :  { %485 = vst [vmem:[%s918_s5 + $0x50] sm:$0xff] %v421_v46 }
 0x163   :  { %v457_v47 = vpop.f32.mrf.mxu3 }
 0x164   :  { %v458_v48 = vadd.f32 %v783_v6, %v457_v47 }
 0x166   :  { %500 = vst [vmem:[%s918_s5 + $0xc8] sm:$0xff] %v458_v48 }
 0x167   :  { %v422_v49 = vpop.f32.mrf.mxu1 }
 0x168   :  { %v423_v50 = vadd.f32 %v783_v6, %v422_v49 }
 0x16a   :  { %486 = vst [vmem:[%s918_s5 + $0x58] sm:$0xff] %v423_v50 }
 0x16b   :  { %v460_v51 = vpop.f32.mrf.mxu3 }
 0x16c   :  { %v461_v52 = vadd.f32 %v783_v6, %v460_v51 }
 0x16e   :  { %501 = vst [vmem:[%s918_s5 + $0xd0] sm:$0xff] %v461_v52 }
 0x16f   :  { %v425_v53 = vpop.f32.mrf.mxu1 }
 0x170   :  { %v426_v54 = vadd.f32 %v783_v6, %v425_v53 }
 0x172   :  { %487 = vst [vmem:[%s918_s5 + $0x60] sm:$0xff] %v426_v54 }
 0x173   :  { %v462_v55 = vpop.f32.mrf.mxu3 }
 0x174   :  { %v463_v56 = vadd.f32 %v783_v6, %v462_v55 }
 0x176   :  { %502 = vst [vmem:[%s918_s5 + $0xd8] sm:$0xff] %v463_v56 }
 0x177   :  { %v427_v57 = vpop.f32.mrf.mxu1 }
 0x178   :  { %v428_v58 = vadd.f32 %v783_v6, %v427_v57 }
 0x17a   :  { %488 = vst [vmem:[%s918_s5 + $0x68] sm:$0xff] %v428_v58 }
 0x17b   :  { %v465_v59 = vpop.f32.mrf.mxu3 }
 0x17c   :  { %v466_v60 = vadd.f32 %v783_v6, %v465_v59 }
 0x17e   :  { %503 = vst [vmem:[%s918_s5 + $0xe0] sm:$0xff] %v466_v60 }
 0x17f   :  { %v430_v61 = vpop.f32.mrf.mxu1 }
 0x180   :  { %v431_v62 = vadd.f32 %v783_v6, %v430_v61 }
 0x182   :  { %489 = vst [vmem:[%s918_s5 + $0x70] sm:$0xff] %v431_v62 }
 0x183   :  { %v467_v63 = vpop.f32.mrf.mxu3 }
 0x184   :  { %v468_v0 = vadd.f32 %v783_v6, %v467_v63 }
 0x186   :  { %504 = vst [vmem:[%s918_s5 + $0xe8] sm:$0xff] %v468_v0 }
 0x187   :  { %v432_v1 = vpop.f32.mrf.mxu1 }
 0x188   :  { %v433_v2 = vadd.f32 %v783_v6, %v432_v1 }
 0x18a   :  { %490 = vst [vmem:[%s918_s5 + $0x78] sm:$0xff] %v433_v2 }
 0x18b   :  { %v470_v3 = vpop.f32.mrf.mxu3 }
 0x18c   :  { %v471_v4 = vadd.f32 %v783_v6, %v470_v3 }
 0x18e   :  { %505 = vst [vmem:[%s918_s5 + $0xf0] sm:$0xff] %v471_v4 }
 0x193   :  { %v472_v5 = vpop.f32.mrf.mxu3 }
 0x194   :  { %v473_v7 = vadd.f32 %v783_v6, %v472_v5 }
 0x196   :  { %506 = vst [vmem:[%s918_s5 + $0xf8] sm:$0xff] %v473_v7 }

</bundles_post_ra>
